<compile_context>
chip_gen: v7x
topology: tpu7x:2x2x1
jax: 0.10.0
libtpu: 0.0.40
codegen_flags: <defaults>
</compile_context>

<pallas_src>
import jax
import jax.numpy as jnp
from jax.experimental import pallas as pl
from jax.experimental.pallas import tpu as pltpu

_TARGET_TILE_BYTES = 4 << 20   # ~4 MiB per block buffer
_VMEM_LIMIT_BYTES = 32 << 20   # explicit scoped-VMEM limit, safe on v5e/v6e/v7x


def _round_up(x, m):
    return -(-x // m) * m


def _make_const_kernel(a, neg_r, x_bar):
    # Coefficients are compile-time constants: no SMEM loads / scalar
    # broadcasts per grid step.
    def kernel(ts_ref, out_ref):
        out_ref[...] = a * jnp.exp(neg_r * ts_ref[...]) + x_bar
    return kernel


def _smem_kernel(params_ref, ts_ref, out_ref):
    # params_ref: SMEM (3,) f32 -> [a = x_init - x_bar, neg_r = -r, x_bar]
    out_ref[...] = (
        params_ref[0] * jnp.exp(params_ref[1] * ts_ref[...]) + params_ref[2]
    )


def _pick_layout(total):
    """Pick (cols, padded_total); cols is a lane-dense multiple of 128."""
    for cols in (512, 256, 128):
        if total % cols == 0:
            return cols, total
    # Ragged tail: pad by < 128 elements (rare path).
    return 128, _round_up(total, 128)


def _pick_tile_rows(rows, cols):
    if rows <= 8:
        return rows  # single block spanning the whole (tiny) array
    target = max(8, _round_up(_TARGET_TILE_BYTES // (cols * 4), 8))
    tile_rows = min(target, _round_up(rows, 8))
    # Keep at least 2 grid steps so both v7x TensorCores get work under the
    # "parallel" semantic (cost on v5e/v6e: one extra ~0.35 us grid step).
    while tile_rows > 8 and pl.cdiv(rows, tile_rows) < 2:
        tile_rows = max(8, _round_up(tile_rows // 2, 8))
    return tile_rows


def system_forward(ts, x_init=2.0, r=0.005, x_bar=1.0):
    """Pallas implementation of System.forward for arbitrary-shaped f32 ts."""
    ts = jnp.asarray(ts, jnp.float32)
    orig_shape = ts.shape
    total = int(ts.size)
    if total == 0:
        return ts

    cols, padded_total = _pick_layout(total)
    rows = padded_total // cols

    ts_flat = ts.reshape(-1)                 # contiguous reshape: free
    padded = padded_total != total
    if padded:
        # Only for ragged sizes (< 128 elems of padding); aligned sizes skip
        # the pad/slice entirely.
        ts_flat = jnp.pad(ts_flat, (0, padded_total - total))
    ts2d = ts_flat.reshape(rows, cols)

    tile_rows = _pick_tile_rows(rows, cols)
    grid = (pl.cdiv(rows, tile_rows),)       # edge block handles the remainder

    ts_spec = pl.BlockSpec((tile_rows, cols), lambda i: (i, 0))
    out_spec = pl.BlockSpec((tile_rows, cols), lambda i: (i, 0))
    out_shape = jax.ShapeDtypeStruct((rows, cols), jnp.float32)
    cost = pl.CostEstimate(
        flops=2 * padded_total,
        transcendentals=padded_total,
        bytes_accessed=8 * padded_total,
    )
    compiler_params = pltpu.CompilerParams(
        dimension_semantics=("parallel",),
        vmem_limit_bytes=_VMEM_LIMIT_BYTES,
    )

    static_scalars = all(
        isinstance(v, (bool, int, float)) for v in (x_init, r, x_bar)
    )
    if static_scalars:
        kernel = _make_const_kernel(
            float(x_init) - float(x_bar), -float(r), float(x_bar)
        )
        out2d = pl.pallas_call(
            kernel,
            out_shape=out_shape,
            grid=grid,
            in_specs=[ts_spec],
            out_specs=out_spec,
            compiler_params=compiler_params,
            cost_estimate=cost,
        )(ts2d)
    else:
        # Traced scalar coefficients ride in SMEM.
        params = jnp.stack(
            [
                jnp.asarray(x_init, jnp.float32) - jnp.asarray(x_bar, jnp.float32),
                -jnp.asarray(r, jnp.float32),
                jnp.asarray(x_bar, jnp.float32),
            ]
        )
        out2d = pl.pallas_call(
            _smem_kernel,
            out_shape=out_shape,
            grid=grid,
            in_specs=[
                pl.BlockSpec(memory_space=pltpu.MemorySpace.SMEM),
                ts_spec,
            ],
            out_specs=out_spec,
            compiler_params=compiler_params,
            cost_estimate=cost,
        )(params, ts2d)

    out_flat = out2d.reshape(-1)
    if padded:
        out_flat = out_flat[:total]
    return out_flat.reshape(orig_shape)


if __name__ == "__main__":
    key = jax.random.PRNGKey(0)
    x_init, r, x_bar = 2.0, 0.005, 1.0

    # Primary example: batch of time points, shape (2, 4, 16, 16) = 2048 elems
    # -> aligned fast path, single full-extent block.
    ts = jax.random.uniform(key, (2, 4, 16, 16), dtype=jnp.float32) * 10.0
    out = jax.block_until_ready(system_forward(ts, x_init=x_init, r=r, x_bar=x_bar))
    ref = (x_init - x_bar) * jnp.exp(-r * ts) + x_bar
    assert out.shape == ts.shape
    assert jnp.allclose(out, ref, atol=1e-5, rtol=1e-5)

    # Secondary check: larger aligned shape exercising the multi-tile
    # ("parallel") grid path with no padding.
    key2 = jax.random.PRNGKey(1)
    ts2 = jax.random.uniform(key2, (8, 64, 128), dtype=jnp.float32) * 10.0
    out2 = jax.block_until_ready(system_forward(ts2, x_init=x_init, r=r, x_bar=x_bar))
    ref2 = (x_init - x_bar) * jnp.exp(-r * ts2) + x_bar
    assert out2.shape == ts2.shape
    assert jnp.allclose(out2, ref2, atol=1e-5, rtol=1e-5)

    # Tertiary check: row count not a multiple of the tile -> edge-block path
    # (1920 = 15 * 128 elements, no pad, grid of 2 with a clipped last block).
    key3 = jax.random.PRNGKey(2)
    ts3 = jax.random.uniform(key3, (2, 4, 16, 15), dtype=jnp.float32) * 10.0
    out3 = jax.block_until_ready(system_forward(ts3, x_init=x_init, r=r, x_bar=x_bar))
    ref3 = (x_init - x_bar) * jnp.exp(-r * ts3) + x_bar
    assert out3.shape == ts3.shape
    assert jnp.allclose(out3, ref3, atol=1e-5, rtol=1e-5)

    print("KERNEL_OK")
</pallas_src>

<mosaic_0001>
module attributes {stable_mosaic.version = 11 : i64} {
  func.func @kernel(%arg0: i32, %arg1: memref<4x512xf32, #tpu.memory_space<vmem>>, %arg2: memref<4x512xf32, #tpu.memory_space<vmem>>) attributes {dimension_semantics = [#tpu.dimension_semantics<parallel>], iteration_bounds = array<i64: 1>, scalar_prefetch = 0 : i64, scratch_operands = 0 : i64, tpu.core_type = #tpu.core_type<tc>, window_params = [{transform_indices = @transform_0, window_bounds = array<i64: 4, 512>}, {transform_indices = @transform_1, window_bounds = array<i64: 4, 512>}]} {
    %c0 = arith.constant 0 : index
    %c0_0 = arith.constant 0 : index
    %0 = vector.load %arg1[%c0, %c0_0] : memref<4x512xf32, #tpu.memory_space<vmem>>, vector<4x512xf32>
    %cst = arith.constant -5.000000e-03 : f32
    %1 = vector.broadcast %cst : f32 to vector<4x512xf32>
    %2 = arith.mulf %1, %0 : vector<4x512xf32>
    %3 = math.exp %2 : vector<4x512xf32>
    %cst_1 = arith.constant 1.000000e+00 : f32
    %4 = vector.broadcast %cst_1 : f32 to vector<4x512xf32>
    %5 = arith.mulf %4, %3 : vector<4x512xf32>
    %cst_2 = arith.constant 1.000000e+00 : f32
    %6 = vector.broadcast %cst_2 : f32 to vector<4x512xf32>
    %7 = arith.addf %5, %6 : vector<4x512xf32>
    %c0_3 = arith.constant 0 : index
    %c0_4 = arith.constant 0 : index
    %8 = vector.load %arg2[%c0_3, %c0_4] : memref<4x512xf32, #tpu.memory_space<vmem>>, vector<4x512xf32>
    tpu.vector_store %arg2[%c0_3, %c0_4], %7 {strides = array<i32>} : memref<4x512xf32, #tpu.memory_space<vmem>>, vector<4x512xf32>,
    return
  }
  func.func @transform_0(%arg0: i32) -> (i32, i32) {
    %c0_i32 = arith.constant 0 : i32
    %c0_i32_0 = arith.constant 0 : i32
    return %arg0, %c0_i32 : i32, i32
  }
  func.func @transform_1(%arg0: i32) -> (i32, i32) {
    %c0_i32 = arith.constant 0 : i32
    %c0_i32_0 = arith.constant 0 : i32
    return %arg0, %c0_i32 : i32, i32
  }
}

</mosaic_0001>

<bundles_post_ra>
// kernel: tpu_custom_call.1
= control target key start
LH: loop header
LB: loop body
LE: loop exit
PB: predicated region body
PF: predicated region fallthrough
CT: control target
= control target key end

     0   :  { %6 = vsyncpa [#allocation3], 0  ;;  %s138_s0 = inlined_call_operand.hbm [shape: f32[4,512], index: 0, kind: input, shape index: {}]   ;;  %s139_s1 = inlined_call_operand.hbm [shape: f32[4,512], index: 1, kind: output, shape index: {}]  }
   0x1   :  { %7 = vsyncpa [#allocation4], 0  ;;  %s102_s6 = smov [#allocation2]   ;;  %s54_s10 = scalar_lea.hbm %s138_s0, 256 }
   0x2   :  { %s14_s7 = sshll.u32 %s102_s6, 4  ;;  %p55_p0 = scmp.ne.s32.totalorder %s138_s0, %s54_s10  ;;  %s15_s7 = int_to_ptr.vmem [resolvable:$true] %s14_s7 }
   0x3   :  { %p58_p1 = scmp.lt.u32.totalorder %s54_s10, %s138_s0 }
   0x5   :  { %p60_p2 = pnand %p58_p1, %p55_p0 }
   0x7   :  { %63 = shalt.err (!%p60_p2)
}
   0x8   :  { %s64_s15 = scalar_lea.vmem %s15_s7, 256  ;;  %p69_p4 = scmp.lt.s32.totalorder %s15_s7, %s15_s7 }
   0x9   :  { %p65_p3 = scmp.ne.s32.totalorder %s15_s7, %s64_s15  ;;  %p70_p5 = scmp.lt.s32.totalorder %s64_s15, %s64_s15 }
   0xb   :  { %p71_p6 = por %p70_p5, %p69_p4 }
   0xd   :  { %p72_p7 = pnand %p71_p6, %p65_p3 }
   0xf   :  { %75 = shalt.err (!%p72_p7)
}
  0x10   :  { %17 = dma.hbm_to_vmem [thread:$0]  %s138_s0, 256, %s15_s7, [#allocation3]  }
  0x11   :  { %98 = dma.done.wait [#allocation3], 256  }
  0x12   :  { %99 = vsyncadd [#allocation3], 4294967040  ;;  %v21_v0 = vld [vmem:[#allocation2] sm:$0xff]  ;;  %v22_v1 = vld [vmem:[#allocation2 + $0x8] sm:$0xff]  ;;  %s103_s18 = smov [#allocation5]  }
  0x13   :  { %v23_v2 = vmul.f32 -0.005, %v21_v0  ;;  %v24_v3 = vmul.f32 -0.005, %v22_v1  ;;  %s39_s19 = sshll.u32 %s103_s18, 4  ;;  %s40_s19 = int_to_ptr.vmem [resolvable:$true] %s39_s19 }
  0x14   :  { %s76_s0 = scalar_lea.vmem %s40_s19, 256  ;;  %p81_p9 = scmp.lt.s32.totalorder %s40_s19, %s40_s19 }
  0x15   :  { %v25_v4 = vmul.f32 1.442695, %v23_v2  ;;  %v27_v5 = vmul.f32 1.442695, %v24_v3  ;;  %p77_p8 = scmp.ne.s32.totalorder %s40_s19, %s76_s0  ;;  %p82_p10 = scmp.lt.s32.totalorder %s76_s0, %s76_s0 }
  0x17   :  { %50 = vpow2.f32 %v25_v4  ;;  %p83_p11 = por %p82_p10, %p81_p9 }
  0x18   :  { %52 = vpow2.f32 %v27_v5 }
  0x19   :  { %p84_p12 = pnand %p83_p11, %p77_p8 }
  0x21   :  { %v51_v6 = vpop.eup %50 }
  0x22   :  { %v53_v7 = vpop.eup %52  ;;  %v29_v8 = vadd.f32 1.0, %v51_v6 }
  0x23   :  { %v30_v9 = vadd.f32 1.0, %v53_v7 }
  0x24   :  { %31 = vst [vmem:[#allocation5] sm:$0xff] %v29_v8 }
  0x25   :  { %32 = vst [vmem:[#allocation5 + $0x8] sm:$0xff] %v30_v9 }
  0x26   :  { %87 = shalt.err (!%p84_p12)
}
  0x27   :  { %s88_s22 = scalar_lea.hbm %s139_s1, 256 }
  0x28   :  { %p89_p13 = scmp.ne.s32.totalorder %s139_s1, %s88_s22  ;;  %p92_p0 = scmp.lt.u32.totalorder %s88_s22, %s139_s1 }
  0x2a   :  { %p94_p1 = pnand %p92_p0, %p89_p13 }
  0x2c   :  { %97 = shalt.err (!%p94_p1)
}
  0x2d   :  { %42 = dma.vmem_to_hbm [thread:$0]  %s40_s19, 256, %s139_s1, [#allocation4]  }
  0x2e   :  { %100 = dma.done.wait [#allocation4], 256  }
  0x2f   :  { %101 = vsyncadd [#allocation4], 4294967040 }
  0x30   :  { %46 = vsyncpa [#allocation3], 1 }
  0x31   :  { %47 = vsyncpa [#allocation4], 1 }

</bundles_post_ra>
